<compile_context>
chip_gen: v5e
topology: v5e:2x2
jax: 0.10.0
libtpu: 0.0.40
codegen_flags: <defaults>
</compile_context>

<pallas_src>
import jax
import jax.numpy as jnp
from jax.experimental import pallas as pl
from jax.experimental.pallas import tpu as pltpu


# ---------------------------------------------------------------------------
# Fused Linear + ReLU kernel
# ---------------------------------------------------------------------------
def linear_relu_kernel(x_ref, w_ref, b_ref, o_ref):
    # x_ref: (M, K)   activations
    # w_ref: (K, bn)  weight tile (torch weight transposed)
    # b_ref: (1, bn)  bias tile
    # o_ref: (M, bn)  output tile
    y = jnp.dot(x_ref[...], w_ref[...], preferred_element_type=jnp.float32)
    o_ref[...] = jnp.maximum(y + b_ref[...], 0.0).astype(o_ref.dtype)


def _pick_block_n(n):
    """Lane-aligned output-column tile.

    Split N into a couple of 128-aligned tiles so the "parallel" grid axis can
    be sharded across TensorCores (v7x megacore); otherwise keep the full
    extent (always legal since block == full array dim).
    """
    if n % 256 == 0:
        return n // 2
    if n % 128 == 0 and n > 128:
        return 128
    return n


def feature_generator_forward(x, w, b):
    """Fused out = relu(x @ w.T + b).

    x: (..., in_features) f32
    w: (out_features, in_features) f32   -- PyTorch nn.Linear layout
    b: (out_features,) f32
    """
    orig_lead = x.shape[:-1]
    in_features = x.shape[-1]
    out_features = w.shape[0]

    x2 = x.reshape(-1, in_features)          # flatten leading dims
    m = x2.shape[0]

    w_t = jnp.transpose(w)                   # (K, N) MXU-friendly layout
    b2 = b.reshape(1, out_features)

    bn = _pick_block_n(out_features)
    grid_n = out_features // bn

    out = pl.pallas_call(
        linear_relu_kernel,
        out_shape=jax.ShapeDtypeStruct((m, out_features), jnp.float32),
        grid_spec=pltpu.PrefetchScalarGridSpec(
            num_scalar_prefetch=0,
            grid=(grid_n,),
            in_specs=[
                pl.BlockSpec((m, in_features), lambda j: (0, 0)),
                pl.BlockSpec((in_features, bn), lambda j: (0, j)),
                pl.BlockSpec((1, bn), lambda j: (0, j)),
            ],
            out_specs=pl.BlockSpec((m, bn), lambda j: (0, j)),
        ),
        compiler_params=pltpu.CompilerParams(
            dimension_semantics=("parallel",)),
    )(x2, w_t, b2)

    return out.reshape(*orig_lead, out_features)


# ---------------------------------------------------------------------------
if __name__ == "__main__":
    # Shapes implied by the module defaults: Linear(768, 768).
    B = 8
    in_features = 768
    hidden_size = 768

    key = jax.random.PRNGKey(0)
    kx, kw, kb = jax.random.split(key, 3)
    x = jax.random.normal(kx, (B, in_features), jnp.float32)
    w = jax.random.normal(kw, (hidden_size, in_features), jnp.float32) * 0.02
    b = jax.random.normal(kb, (hidden_size,), jnp.float32) * 0.02

    out = jax.block_until_ready(feature_generator_forward(x, w, b))
    assert out.shape == (B, hidden_size), out.shape

    # Pure-JAX reference mirroring the PyTorch forward.
    ref = jax.block_until_ready(
        jax.nn.relu(jnp.dot(x, w.T, precision=jax.lax.Precision.HIGHEST) + b))
    max_err = float(jnp.max(jnp.abs(out - ref)))
    assert jnp.allclose(out, ref, rtol=2e-2, atol=2e-2), max_err

    print("KERNEL_OK")
</pallas_src>

<mosaic_0001>
module attributes {stable_mosaic.version = 11 : i64} {
  func.func @linear_relu_kernel(%arg0: i32, %arg1: memref<8x768xf32, #tpu.memory_space<vmem>>, %arg2: memref<768x384xf32, #tpu.memory_space<vmem>>, %arg3: memref<1x384xf32, #tpu.memory_space<vmem>>, %arg4: memref<8x384xf32, #tpu.memory_space<vmem>>) attributes {dimension_semantics = [#tpu.dimension_semantics<parallel>], iteration_bounds = array<i64: 2>, scalar_prefetch = 0 : i64, scratch_operands = 0 : i64, tpu.core_type = #tpu.core_type<tc>, window_params = [{pipeline_mode = #tpu.pipeline_mode<synchronous>, transform_indices = @transform_0, window_bounds = array<i64: 8, 768>}, {transform_indices = @transform_1, window_bounds = array<i64: 768, 384>}, {transform_indices = @transform_2, window_bounds = array<i64: 1, 384>}, {transform_indices = @transform_3, window_bounds = array<i64: 8, 384>}]} {
    %c0 = arith.constant 0 : index
    %c0_0 = arith.constant 0 : index
    %0 = vector.load %arg1[%c0, %c0_0] : memref<8x768xf32, #tpu.memory_space<vmem>>, vector<8x768xf32>
    %c0_1 = arith.constant 0 : index
    %c0_2 = arith.constant 0 : index
    %1 = vector.load %arg2[%c0_1, %c0_2] : memref<768x384xf32, #tpu.memory_space<vmem>>, vector<768x384xf32>
    %cst = arith.constant dense<0.000000e+00> : vector<8x384xf32>
    %2 = tpu.matmul %0, %1, %cst {dimension_numbers = #tpu.dot_dimension_numbers<[1], [0], [0], [1], [0, 0, 1, 1], [], []>} : vector<8x768xf32>, vector<768x384xf32>, vector<8x384xf32> -> vector<8x384xf32>
    %c0_3 = arith.constant 0 : index
    %c0_4 = arith.constant 0 : index
    %3 = vector.load %arg3[%c0_3, %c0_4] : memref<1x384xf32, #tpu.memory_space<vmem>>, vector<1x384xf32>
    %4 = vector.broadcast %3 : vector<1x384xf32> to vector<8x384xf32>
    %5 = arith.addf %2, %4 : vector<8x384xf32>
    %cst_5 = arith.constant 0.000000e+00 : f32
    %6 = vector.broadcast %cst_5 : f32 to vector<8x384xf32>
    %7 = arith.maximumf %5, %6 : vector<8x384xf32>
    %c0_6 = arith.constant 0 : index
    %c0_7 = arith.constant 0 : index
    %8 = vector.load %arg4[%c0_6, %c0_7] : memref<8x384xf32, #tpu.memory_space<vmem>>, vector<8x384xf32>
    tpu.vector_store %arg4[%c0_6, %c0_7], %7 {strides = array<i32>} : memref<8x384xf32, #tpu.memory_space<vmem>>, vector<8x384xf32>,
    return
  }
  func.func @transform_0(%arg0: i32) -> (i32, i32) {
    %c0_i32 = arith.constant 0 : i32
    %c0_i32_0 = arith.constant 0 : i32
    %c0_i32_1 = arith.constant 0 : i32
    return %c0_i32, %c0_i32_0 : i32, i32
  }
  func.func @transform_1(%arg0: i32) -> (i32, i32) {
    %c0_i32 = arith.constant 0 : i32
    %c0_i32_0 = arith.constant 0 : i32
    return %c0_i32, %arg0 : i32, i32
  }
  func.func @transform_2(%arg0: i32) -> (i32, i32) {
    %c0_i32 = arith.constant 0 : i32
    %c0_i32_0 = arith.constant 0 : i32
    return %c0_i32, %arg0 : i32, i32
  }
  func.func @transform_3(%arg0: i32) -> (i32, i32) {
    %c0_i32 = arith.constant 0 : i32
    %c0_i32_0 = arith.constant 0 : i32
    return %c0_i32, %arg0 : i32, i32
  }
}

</mosaic_0001>

<bundles_post_ra>
// kernel: tpu_custom_call.1
= control target key start
LH: loop header
LB: loop body
LE: loop exit
PB: predicated region body
PF: predicated region fallthrough
CT: control target
= control target key end

     0   :  { %s1797_s0 = inlined_call_operand.hbm [shape: f32[8,768], index: 0, kind: input, shape index: {}]   ;;  %s1798_s1 = inlined_call_operand.hbm [shape: f32[768,768], index: 1, kind: input, shape index: {}]   ;;  %s1799_s2 = inlined_call_operand.hbm [shape: f32[1,768], index: 2, kind: input, shape index: {}]   ;;  %s1800_s3 = inlined_call_operand.hbm [shape: f32[8,768], index: 3, kind: output, shape index: {}]  }
   0x1   :  { %1801 = sst [smem:[#allocation12_spill]] %s1797_s0 }
   0x2   :  { %8 = vsyncpa [#allocation3], 0 }
   0x3   :  { %9 = vsyncpa [#allocation6], 0 }
   0x4   :  { %11 = vsyncpa [#allocation6 + $0x1], 0 }
   0x5   :  { %12 = vsyncpa [#allocation4], 0 }
   0x6   :  { %14 = vsyncpa [#allocation4 + $0x1], 0  ;;  %s1300_s12 = smov 0   ;;  %s1302_s13 = smov 0  }
   0x7   :  { %s1304_s14 = smov 0   ;;  %s1306_s15 = smov 0  }
   0x8 LB: > { %s1321_s16 = sadd.s32 1, %s1274_s15   ;;  %s48_s17 = sadd.s32 1, %s1270_s14  ;;  %s1274_s15 = sphi %s1306_s15, %s1812_s15   ;;  %s1270_s14 = sphi %s1304_s14, %s1811_s14   ;;  %s1266_s13 = sphi %s1302_s13, %s1810_s13   ;;  %s1262_s12 = sphi %s1300_s12, %s1809_s12  }
   0x9   : > { %s45_s18 = ssub.s32 %s1274_s15, %s1321_s16  ;;  %p55_p0 = scmp.ne.s32.totalorder %s1270_s14, %s1266_s13 }
   0xa   : > { %p46_p1 = scmp.eq.s32.totalorder %s45_s18, 0  ;;  %p56_p2 = scmp.eq.s32.totalorder %s1274_s15, 0 }
   0xb   : > { %p1075_p4 = scmp.lt.s32.totalorder %s1274_s15, 2  ;;  %s149_s20 = sand.u32 1, %s1274_s15  }
   0xc   : > { %s1332_s19 = scalar_select %p46_p1, %s1270_s14, %s48_s17  }
   0xd   : > { %p57_p5 = por %p56_p2, %p55_p0  ;;  %s151_s21 = sand.u32 1, %s1270_s14  }
   0xe   : > { %s1044_s22 = smul.u32 2304, %s151_s21  ;;  %s1349_s4 = scalar_lea.sflag [#allocation6], %s149_s20 }
   0xf   : > { %p1341_p6 = pnand %p1075_p4, %p57_p5  ;;  %s1042_s24 = smul.u32 24, %s1274_s15 }
  0x10   : > { %s153_s28 = scalar_lea.vmem [#allocation5], %s1044_s22  ;;  %s1121_s9 = scalar_lea.hbm %s1798_s1, 4608 }
  0x11   : > { %s158_s27 = scalar_lea.hbm %s1798_s1, %s1042_s24  ;;  %s161_s29 = sshll.u32 %s153_s28, 4  ;;  %s162_s29 = int_to_ptr.vmem [resolvable:$true] %s161_s29 }
  0x12   : > { %s159_s30 = sshll.u32 %s158_s27, 4  ;;  %p1118_p8 = pneg %p1341_p6  ;;  %s160_s30 = int_to_ptr.hbm [resolvable:$true] %s159_s30 }
  0x13   : > { %s1114_s5 = sshra.s32 %s160_s30, 4  ;;  %s1115_s5 = int_to_ptr.hbm [resolvable:$true] %s1114_s5 }
  0x14   : > { %s1116_s6 = scalar_lea.hbm %s1115_s5, 2304  ;;  %p1122_p11 = scmp.lt.s32.totalorder %s1115_s5, %s1798_s1 }
  0x15   : > { %p1117_p7 = scmp.ne.s32.totalorder %s1115_s5, %s1116_s6  ;;  %p1123_p12 = scmp.lt.s32.totalorder %s1121_s9, %s1116_s6 }
  0x17   : > { %p1119_p9 = pnand %p1118_p8, %p1117_p7  ;;  %p1124_p13 = por %p1123_p12, %p1122_p11 }
  0x19   : > { %p1120_p10 = pneg %p1119_p9 }
  0x1b   : > { %p1125_p1 = pnand %p1124_p13, %p1120_p10 }
  0x1d   : > { %1128 = shalt.err (!%p1125_p1)
}
  0x1e   : > { %s1276_s17 = smov 768   ;;  %s1277_s18 = smov 384  }
  0x1f   : > { %s1278_s20 = smov 24   ;;  %s1366_s22 = sadd.s32 4294967295, %s1274_s15  }
  0x20   : > { %1066 = dma.hbm_to_vmem [thread:$0]  (!%p1341_p6), %s160_s30, 36864, %s162_s29, %s1349_s4, %s1276_s17, %s1277_s18, %s1278_s20  }
  0x21   : > { %s1032_s24 = sadd.s32 4294967294, %s1274_s15   ;;  %p61_p2 = scmp.ne.s32.totalorder %s1266_s13, %s1262_s12 }
  0x22   : > { %p62_p4 = scmp.eq.s32.totalorder %s1366_s22, 0  ;;  %p111_p5 = scmp.eq.s32.totalorder %s1366_s22, 1 }
  0x23   : > { %p117_p7 = scmp.eq.s32.totalorder %s1032_s24, 1  ;;  %p1033_p9 = scmp.ge.s32.totalorder %s1274_s15, 1 }
  0x24   : > { %p1376_p10 = por %p62_p4, %p61_p2  ;;  %p1383_p11 = por %p111_p5, %p55_p0 }
  0x25   : > { %p1387_p12 = por %p117_p7, %p61_p2  ;;  %p124_p13 = scmp.lt.s32.totalorder %s1274_s15, 3 }
  0x26   : > { %s1806_s0 = sld [smem:[#allocation12_spill]]  ;;  %s1045_s6 = smul.u32 3, %s151_s21 }
  0x27   : > { %p1395_p1 = pnand %p1033_p9, %p124_p13  ;;  %s1279_s7 = smov [#allocation2]  }
  0x28   : > { %s138_s8 = sshll.u32 %s1279_s7, 4  ;;  %s176_s9 = smul.u32 3, %s1274_s15  ;;  %s139_s8 = int_to_ptr.vmem [resolvable:$true] %s138_s8 }
  0x29   : > { %p1059_p0 = pneg %p1395_p1  ;;  %s175_s10 = scalar_lea.vmem [#allocation7], %s1045_s6 }
  0x2a   : > { %s183_s11 = sshll.u32 %s175_s10, 4  ;;  %s179_s20 = scalar_lea.hbm %s1799_s2, %s176_s9  ;;  %s184_s11 = int_to_ptr.vmem [resolvable:$true] %s183_s11 }
  0x2b   : > { %p1060_p2 = pnand %p1059_p0, %p62_p4  ;;  %s181_s24 = sshll.u32 %s179_s20, 4  ;;  %s182_s24 = int_to_ptr.hbm [resolvable:$true] %s181_s24 }
  0x2c   : > { %s136_s30 = sshll.u32 %s1806_s0, 4  ;;  %s1174_s21 = sshra.s32 %s182_s24, 4  ;;  %s137_s30 = int_to_ptr.hbm [resolvable:$true] %s136_s30  ;;  %s1175_s21 = int_to_ptr.hbm [resolvable:$true] %s1174_s21 }
  0x2d   : > { %1062 = dma.hbm_to_vmem [thread:$0]  (!%p1060_p2), %s137_s30, 768, %s139_s8, [#allocation3]  }
  0x2e   : > { %s1176_s28 = scalar_lea.hbm %s1175_s21, 3  ;;  %s1181_s6 = scalar_lea.hbm %s1799_s2, 6 }
  0x2f   : > { %p1177_p5 = scmp.ne.s32.totalorder %s1175_s21, %s1176_s28  ;;  %p1182_p13 = scmp.lt.s32.totalorder %s1175_s21, %s1799_s2 }
  0x30   : > { %p1183_p0 = scmp.lt.s32.totalorder %s1181_s6, %s1176_s28 }
  0x31   : > { %p1179_p7 = pnand %p1177_p5, %p1118_p8 }
  0x32   : > { %p1184_p2 = por %p1183_p0, %p1182_p13 }
  0x33   : > { %p1180_p9 = pneg %p1179_p7 }
  0x35   : > { %p1185_p3 = pnand %p1184_p2, %p1180_p9 }
  0x37   : > { %1188 = shalt.err (!%p1185_p3)
}
  0x38   : > { %1069 = dma.hbm_to_vmem [thread:$0]  (!%p1341_p6), %s182_s24, 48, %s184_s11, %s1349_s4  }
  0x39   : > { %192 = sbr.rel (%p1395_p1) target bundleno = 363 (0x16b), region = 32 }
  0x3e   : > { %1249 = dma.done.wait (%p62_p4), [#allocation3], 768  }
  0x3f   : > { %1251 = vsyncadd (%p62_p4), [#allocation3], 4294966528  ;;  %s199_s0 = sand.u32 1, %s1366_s22   ;;  %s1429_s30 = sand.u32 1, %s1266_s13  }
  0x40   : > { %s1046_s8 = smul.u32 2304, %s1429_s30  ;;  %s200_s23 = scalar_lea.sflag [#allocation6], %s199_s0 }
  0x42   : > { %s1432_s9 = scalar_lea.vmem [#allocation5], %s1046_s8 }
  0x43   : > { %1253 = dma.done.wait (%p1376_p10), %s200_s23, 36912  }
  0x44   : > { %1255 = vsyncadd (%p1376_p10), %s200_s23, 4294930384  ;;  %v296_v0 = vld [vmem:[%s1432_s9 + $0x168] sm:$0xff]  ;;  %v293_v1 = vld [vmem:[%s1432_s9 + $0x150] sm:$0xff]  ;;  %s1047_s4 = smul.u32 3, %s1429_s30  ;;  %s914_s29 = scalar_lea.sflag [#allocation4], %s1429_s30 }
  0x45   : > { %v344_v2 = vld [vmem:[%s1432_s9 + $0x2e8] sm:$0xff]  ;;  %547 = vmatpush.msra.mxu0 %v296_v0  ;;  %v341_v3 = vld [vmem:[%s1432_s9 + $0x2d0] sm:$0xff]  ;;  %v290_v4 = vld [vmem:[%s1432_s9 + $0x138] sm:$0xff]  ;;  %s1048_s5 = smul.u32 24, %s1429_s30  ;;  %s1224_s0 = scalar_lea.hbm %s1800_s3, 48 }
  0x46   : > { %567 = vmatpush.msra.mxu1 %v344_v2  ;;  %v338_v5 = vld [vmem:[%s1432_s9 + $0x2b8] sm:$0xff]  ;;  %v287_v6 = vld [vmem:[%s1432_s9 + $0x120] sm:$0xff]  ;;  %v284_v8 = vld [vmem:[%s1432_s9 + $0x108] sm:$0xff]  ;;  %s213_s25 = scalar_lea.vmem [#allocation7], %s1047_s4  ;;  %s1043_s17 = smul.u32 24, %s1366_s22 }
  0x47   : > { %548 = vmatpush.msra.mxu0 %v293_v1  ;;  %v335_v7 = vld [vmem:[%s1432_s9 + $0x2a0] sm:$0xff]  ;;  %v332_v9 = vld [vmem:[%s1432_s9 + $0x288] sm:$0xff]  ;;  %v281_v10 = vld [vmem:[%s1432_s9 + $0xf0] sm:$0xff]  ;;  %s1758_s11 = scalar_lea.vmem [#allocation8], %s1048_s5 }
  0x48   : > { %568 = vmatpush.msra.mxu1 %v341_v3  ;;  %v392_v11 = vld [vmem:[%s1432_s9 + $0x468] sm:$0xff]  ;;  %v329_v12 = vld [vmem:[%s1432_s9 + $0x270] sm:$0xff]  ;;  %v386_v15 = vld [vmem:[%s1432_s9 + $0x438] sm:$0xff]  ;;  %s925_s24 = scalar_lea.hbm %s1800_s3, %s1043_s17  ;;  %s927_s21 = sshll.u32 %s1758_s11, 4  ;;  %s928_s21 = int_to_ptr.vmem [resolvable:$true] %s927_s21 }
  0x49   : > { %549 = vmatpush.msra.mxu0 %v290_v4  ;;  %587 = vmatpush.msra.mxu2 %v392_v11  ;;  %v389_v13 = vld [vmem:[%s1432_s9 + $0x450] sm:$0xff]  ;;  %v440_v14 = vld [vmem:[%s1432_s9 + $0x5e8] sm:$0xff]  ;;  %v278_v17 = vld [vmem:[%s1432_s9 + $0xd8] sm:$0xff]  ;;  %s929_s28 = sshll.u32 %s925_s24, 4  ;;  %s930_s28 = int_to_ptr.hbm [resolvable:$true] %s929_s28 }
  0x4a   : > { %569 = vmatpush.msra.mxu1 %v338_v5  ;;  %v437_v16 = vld [vmem:[%s1432_s9 + $0x5d0] sm:$0xff]  ;;  %v326_v18 = vld [vmem:[%s1432_s9 + $0x258] sm:$0xff]  ;;  %607 = vmatpush.msra.mxu3 %v440_v14  ;;  %v383_v19 = vld [vmem:[%s1432_s9 + $0x420] sm:$0xff]  ;;  %s1218_s22 = sshra.s32 %s930_s28, 4  ;;  %s1219_s22 = int_to_ptr.hbm [resolvable:$true] %s1218_s22 }
  0x4b   : > { %550 = vmatpush.msra.mxu0 %v287_v6  ;;  %588 = vmatpush.msra.mxu2 %v389_v13  ;;  %v434_v20 = vld [vmem:[%s1432_s9 + $0x5b8] sm:$0xff]  ;;  %v275_v21 = vld [vmem:[%s1432_s9 + $0xc0] sm:$0xff]  ;;  %v380_v23 = vld [vmem:[%s1432_s9 + $0x408] sm:$0xff]  ;;  %s1220_s7 = scalar_lea.hbm %s1219_s22, 24  ;;  %p1225_p4 = scmp.lt.s32.totalorder %s1219_s22, %s1800_s3 }
  0x4c   : > { %570 = vmatpush.msra.mxu1 %v335_v7  ;;  %v323_v22 = vld [vmem:[%s1432_s9 + $0x240] sm:$0xff]  ;;  %608 = vmatpush.msra.mxu3 %v437_v16  ;;  %v272_v25 = vld [vmem:[%s1432_s9 + $0xa8] sm:$0xff]  ;;  %v377_v27 = vld [vmem:[%s1432_s9 + $0x3f0] sm:$0xff]  ;;  %p1221_p3 = scmp.ne.s32.totalorder %s1219_s22, %s1220_s7  ;;  %p1226_p10 = scmp.lt.s32.totalorder %s1224_s0, %s1220_s7 }
  0x4d   : > { %551 = vmatpush.msra.mxu0 %v284_v8  ;;  %589 = vmatpush.msra.mxu2 %v386_v15  ;;  %v431_v24 = vld [vmem:[%s1432_s9 + $0x5a0] sm:$0xff]  ;;  %v320_v26 = vld [vmem:[%s1432_s9 + $0x228] sm:$0xff]  ;;  %v269_v29 = vld [vmem:[%s1432_s9 + $0x90] sm:$0xff] }
  0x4e   : > { %571 = vmatpush.msra.mxu1 %v332_v9  ;;  %609 = vmatpush.msra.mxu3 %v434_v20  ;;  %v428_v28 = vld [vmem:[%s1432_s9 + $0x588] sm:$0xff]  ;;  %v317_v30 = vld [vmem:[%s1432_s9 + $0x210] sm:$0xff]  ;;  %v374_v31 = vld [vmem:[%s1432_s9 + $0x3d8] sm:$0xff]  ;;  %p1222_p6 = pnand %p1221_p3, %p1383_p11  ;;  %p1227_p1 = por %p1226_p10, %p1225_p4 }
  0x4f   : > { %552 = vmatpush.msra.mxu0 %v281_v10  ;;  %590 = vmatpush.msra.mxu2 %v383_v19  ;;  %v425_v32 = vld [vmem:[%s1432_s9 + $0x570] sm:$0xff]  ;;  %v266_v33 = vld [vmem:[%s1432_s9 + $0x78] sm:$0xff]  ;;  %v371_v35 = vld [vmem:[%s1432_s9 + $0x3c0] sm:$0xff] }
  0x50   : > { %572 = vmatpush.msra.mxu1 %v329_v12  ;;  %610 = vmatpush.msra.mxu3 %v431_v24  ;;  %v314_v34 = vld [vmem:[%s1432_s9 + $0x1f8] sm:$0xff]  ;;  %v263_v37 = vld [vmem:[%s1432_s9 + $0x60] sm:$0xff]  ;;  %v368_v39 = vld [vmem:[%s1432_s9 + $0x3a8] sm:$0xff]  ;;  %p1223_p8 = pneg %p1222_p6 }
  0x51   : > { %553 = vmatpush.msra.mxu0 %v278_v17  ;;  %591 = vmatpush.msra.mxu2 %v380_v23  ;;  %v422_v36 = vld [vmem:[%s1432_s9 + $0x558] sm:$0xff]  ;;  %v311_v38 = vld [vmem:[%s1432_s9 + $0x1e0] sm:$0xff]  ;;  %v260_v41 = vld [vmem:[%s1432_s9 + $0x48] sm:$0xff] }
  0x52   : > { %573 = vmatpush.msra.mxu1 %v326_v18  ;;  %611 = vmatpush.msra.mxu3 %v428_v28  ;;  %v419_v40 = vld [vmem:[%s1432_s9 + $0x540] sm:$0xff]  ;;  %v308_v42 = vld [vmem:[%s1432_s9 + $0x1c8] sm:$0xff]  ;;  %v365_v43 = vld [vmem:[%s1432_s9 + $0x390] sm:$0xff]  ;;  %p1228_p5 = pnand %p1227_p1, %p1223_p8 }
  0x53   : > { %554 = vmatpush.msra.mxu0 %v275_v21  ;;  %592 = vmatpush.msra.mxu2 %v377_v27  ;;  %v416_v44 = vld [vmem:[%s1432_s9 + $0x528] sm:$0xff]  ;;  %v257_v45 = vld [vmem:[%s1432_s9 + $0x30] sm:$0xff]  ;;  %v362_v47 = vld [vmem:[%s1432_s9 + $0x378] sm:$0xff] }
  0x54   : > { %574 = vmatpush.msra.mxu1 %v323_v22  ;;  %612 = vmatpush.msra.mxu3 %v425_v32  ;;  %v305_v46 = vld [vmem:[%s1432_s9 + $0x1b0] sm:$0xff]  ;;  %v254_v49 = vld [vmem:[%s1432_s9 + $0x18] sm:$0xff]  ;;  %v359_v51 = vld [vmem:[%s1432_s9 + $0x360] sm:$0xff] }
  0x55   : > { %555 = vmatpush.msra.mxu0 %v272_v25  ;;  %593 = vmatpush.msra.mxu2 %v374_v31  ;;  %v413_v48 = vld [vmem:[%s1432_s9 + $0x510] sm:$0xff]  ;;  %v302_v50 = vld [vmem:[%s1432_s9 + $0x198] sm:$0xff]  ;;  %v251_v53 = vld [vmem:[%s1432_s9] sm:$0xff] }
  0x56   : > { %575 = vmatpush.msra.mxu1 %v320_v26  ;;  %613 = vmatpush.msra.mxu3 %v422_v36  ;;  %v410_v52 = vld [vmem:[%s1432_s9 + $0x4f8] sm:$0xff]  ;;  %v299_v54 = vld [vmem:[%s1432_s9 + $0x180] sm:$0xff]  ;;  %v488_v55 = vld [vmem:[%s1432_s9 + $0x768] sm:$0xff] }
  0x57   : > { %556 = vmatpush.msra.mxu0 %v269_v29  ;;  %594 = vmatpush.msra.mxu2 %v371_v35  ;;  %v536_v56 = vld [vmem:[%s1432_s9 + $0x8e8] sm:$0xff]  ;;  %v407_v58 = vld [vmem:[%s1432_s9 + $0x4e0] sm:$0xff]  ;;  %v485_v59 = vld [vmem:[%s1432_s9 + $0x750] sm:$0xff] }
  0x58   : > { %576 = vmatpush.msra.mxu1 %v317_v30  ;;  %614 = vmatpush.msra.mxu3 %v419_v40  ;;  %v356_v57 = vld [vmem:[%s1432_s9 + $0x348] sm:$0xff]  ;;  %v533_v60 = vld [vmem:[%s1432_s9 + $0x8d0] sm:$0xff]  ;;  %v482_v63 = vld [vmem:[%s1432_s9 + $0x738] sm:$0xff] }
  0x59   : > { %557 = vmatpush.msra.mxu0 %v266_v33  ;;  %595 = vmatpush.msra.mxu2 %v368_v39  ;;  %v353_v61 = vld [vmem:[%s1432_s9 + $0x330] sm:$0xff]  ;;  %v404_v62 = vld [vmem:[%s1432_s9 + $0x4c8] sm:$0xff]  ;;  %v530_v0 = vld [vmem:[%s1432_s9 + $0x8b8] sm:$0xff] }
  0x5a   : > { %577 = vmatpush.msra.mxu1 %v314_v34  ;;  %615 = vmatpush.msra.mxu3 %v416_v44  ;;  %v350_v1 = vld [vmem:[%s1432_s9 + $0x318] sm:$0xff]  ;;  %v401_v2 = vld [vmem:[%s1432_s9 + $0x4b0] sm:$0xff]  ;;  %v479_v3 = vld [vmem:[%s1432_s9 + $0x720] sm:$0xff] }
  0x5b   : > { %558 = vmatpush.msra.mxu0 %v263_v37  ;;  %596 = vmatpush.msra.mxu2 %v365_v43  ;;  %v527_v4 = vld [vmem:[%s1432_s9 + $0x8a0] sm:$0xff]  ;;  %v398_v6 = vld [vmem:[%s1432_s9 + $0x498] sm:$0xff]  ;;  %v476_v7 = vld [vmem:[%s1432_s9 + $0x708] sm:$0xff] }
  0x5c   : > { %578 = vmatpush.msra.mxu1 %v311_v38  ;;  %616 = vmatpush.msra.mxu3 %v413_v48  ;;  %v347_v5 = vld [vmem:[%s1432_s9 + $0x300] sm:$0xff]  ;;  %v524_v8 = vld [vmem:[%s1432_s9 + $0x888] sm:$0xff]  ;;  %v297_v9 = vld [vmem:[%s1432_s9 + $0x170] sm:$0xff] }
  0x5d   : > { %559 = vmatpush.msra.mxu0 %v260_v41  ;;  %597 = vmatpush.msra.mxu2 %v362_v47  ;;  %v395_v10 = vld [vmem:[%s1432_s9 + $0x480] sm:$0xff]  ;;  %v473_v11 = vld [vmem:[%s1432_s9 + $0x6f0] sm:$0xff]  ;;  %v294_v13 = vld [vmem:[%s1432_s9 + $0x158] sm:$0xff] }
  0x5e   : > { %579 = vmatpush.msra.mxu1 %v308_v42  ;;  %617 = vmatpush.msra.mxu3 %v410_v52  ;;  %v521_v12 = vld [vmem:[%s1432_s9 + $0x870] sm:$0xff]  ;;  %v470_v15 = vld [vmem:[%s1432_s9 + $0x6d8] sm:$0xff]  ;;  %v291_v17 = vld [vmem:[%s1432_s9 + $0x140] sm:$0xff] }
  0x5f   : > { %560 = vmatpush.msra.mxu0 %v257_v45  ;;  %598 = vmatpush.msra.mxu2 %v359_v51  ;;  %v345_v14 = vld [vmem:[%s1432_s9 + $0x2f0] sm:$0xff]  ;;  %v518_v16 = vld [vmem:[%s1432_s9 + $0x858] sm:$0xff]  ;;  %v467_v19 = vld [vmem:[%s1432_s9 + $0x6c0] sm:$0xff] }
  0x60   : > { %580 = vmatpush.msra.mxu1 %v305_v46  ;;  %618 = vmatpush.msra.mxu3 %v407_v58  ;;  %v342_v18 = vld [vmem:[%s1432_s9 + $0x2d8] sm:$0xff]  ;;  %v515_v20 = vld [vmem:[%s1432_s9 + $0x840] sm:$0xff]  ;;  %v288_v21 = vld [vmem:[%s1432_s9 + $0x128] sm:$0xff] }
  0x61   : > { %561 = vmatpush.msra.mxu0 %v254_v49  ;;  %599 = vmatpush.msra.mxu2 %v356_v57  ;;  %v339_v22 = vld [vmem:[%s1432_s9 + $0x2c0] sm:$0xff]  ;;  %v464_v23 = vld [vmem:[%s1432_s9 + $0x6a8] sm:$0xff]  ;;  %v461_v27 = vld [vmem:[%s1432_s9 + $0x690] sm:$0xff] }
  0x62   : > { %581 = vmatpush.msra.mxu1 %v302_v50  ;;  %619 = vmatpush.msra.mxu3 %v404_v62  ;;  %v512_v24 = vld [vmem:[%s1432_s9 + $0x828] sm:$0xff]  ;;  %v1527_v25 = vld [vmem:[#allocation2 + $0x10] sm:$0xff]  ;;  %v509_v28 = vld [vmem:[%s1432_s9 + $0x810] sm:$0xff] }
  0x63   : > { %562 = vmatpush.msra.mxu0 %v251_v53  ;;  %600 = vmatpush.msra.mxu2 %v353_v61  ;;  %v336_v26 = vld [vmem:[%s1432_s9 + $0x2a8] sm:$0xff]  ;;  %v285_v29 = vld [vmem:[%s1432_s9 + $0x110] sm:$0xff]  ;;  %v458_v31 = vld [vmem:[%s1432_s9 + $0x678] sm:$0xff] }
  0x64   : > { %582 = vmatpush.msra.mxu1 %v299_v54  ;;  %620 = vmatpush.msra.mxu3 %v401_v2  ;;  %v1533_v30 = vld [vmem:[#allocation2] sm:$0xff]  ;;  %v506_v32 = vld [vmem:[%s1432_s9 + $0x7f8] sm:$0xff]  ;;  %v1538_v33 = vld [vmem:[#allocation2 + $0x18] sm:$0xff] }
  0x65   : > { %627 = vmatpush.msrb.mxu0 %v488_v55  ;;  %601 = vmatpush.msra.mxu2 %v350_v1  ;;  %v282_v34 = vld [vmem:[%s1432_s9 + $0xf8] sm:$0xff]  ;;  %v455_v35 = vld [vmem:[%s1432_s9 + $0x660] sm:$0xff]  ;;  %v333_v37 = vld [vmem:[%s1432_s9 + $0x290] sm:$0xff] }
  0x66   : > { %647 = vmatpush.msrb.mxu1 %v536_v56  ;;  %621 = vmatpush.msra.mxu3 %v398_v6  ;;  %v503_v36 = vld [vmem:[%s1432_s9 + $0x7e0] sm:$0xff]  ;;  %v1545_v38 = vld [vmem:[#allocation2 + $0x8] sm:$0xff]  ;;  %v452_v39 = vld [vmem:[%s1432_s9 + $0x648] sm:$0xff] }
  0x67   : > { %628 = vmatpush.msrb.mxu0 %v485_v59  ;;  %602 = vmatpush.msra.mxu2 %v347_v5  ;;  %v500_v40 = vld [vmem:[%s1432_s9 + $0x7c8] sm:$0xff]  ;;  %v279_v41 = vld [vmem:[%s1432_s9 + $0xe0] sm:$0xff]  ;;  %v330_v42 = vld [vmem:[%s1432_s9 + $0x278] sm:$0xff] }
  0x68   : > { %648 = vmatpush.msrb.mxu1 %v533_v60  ;;  %622 = vmatpush.msra.mxu3 %v395_v10  ;;  %v449_v43 = vld [vmem:[%s1432_s9 + $0x630] sm:$0xff]  ;;  %v276_v45 = vld [vmem:[%s1432_s9 + $0xc8] sm:$0xff]  ;;  %v327_v46 = vld [vmem:[%s1432_s9 + $0x260] sm:$0xff] }
  0x69   : > { %629 = vmatpush.msrb.mxu0 %v482_v63  ;;  %667 = vmatpush.msrb.mxu2 %v297_v9  ;;  %v497_v44 = vld [vmem:[%s1432_s9 + $0x7b0] sm:$0xff]  ;;  %v446_v47 = vld [vmem:[%s1432_s9 + $0x618] sm:$0xff]  ;;  %v324_v50 = vld [vmem:[%s1432_s9 + $0x248] sm:$0xff] }
  0x6a   : > { %649 = vmatpush.msrb.mxu1 %v530_v0  ;;  %687 = vmatpush.msrb.mxu3 %v345_v14  ;;  %v494_v48 = vld [vmem:[%s1432_s9 + $0x798] sm:$0xff]  ;;  %v273_v49 = vld [vmem:[%s1432_s9 + $0xb0] sm:$0xff]  ;;  %v443_v51 = vld [vmem:[%s1432_s9 + $0x600] sm:$0xff] }
  0x6b   : > { %630 = vmatpush.msrb.mxu0 %v479_v3  ;;  %668 = vmatpush.msrb.mxu2 %v294_v13  ;;  %v491_v52 = vld [vmem:[%s1432_s9 + $0x780] sm:$0xff]  ;;  %v393_v53 = vld [vmem:[%s1432_s9 + $0x470] sm:$0xff]  ;;  %v270_v56 = vld [vmem:[%s1432_s9 + $0x98] sm:$0xff] }
  0x6c   : > { %650 = vmatpush.msrb.mxu1 %v527_v4  ;;  %688 = vmatpush.msrb.mxu3 %v342_v18  ;;  %v441_v54 = vld [vmem:[%s1432_s9 + $0x5f0] sm:$0xff]  ;;  %v390_v57 = vld [vmem:[%s1432_s9 + $0x458] sm:$0xff]  ;;  %v387_v61 = vld [vmem:[%s1432_s9 + $0x440] sm:$0xff] }
  0x6d   : > { %631 = vmatpush.msrb.mxu0 %v476_v7  ;;  %669 = vmatpush.msrb.mxu2 %v291_v17  ;;  %v1565_v55 = vld [vmem:[#allocation2 + $0x20] sm:$0xff]  ;;  %v438_v58 = vld [vmem:[%s1432_s9 + $0x5d8] sm:$0xff]  ;;  %v435_v62 = vld [vmem:[%s1432_s9 + $0x5c0] sm:$0xff] }
  0x6e   : > { %651 = vmatpush.msrb.mxu1 %v524_v8  ;;  %689 = vmatpush.msrb.mxu3 %v339_v22  ;;  %v321_v59 = vld [vmem:[%s1432_s9 + $0x230] sm:$0xff]  ;;  %v1571_v60 = vld [vmem:[#allocation2 + $0x28] sm:$0xff]  ;;  %v267_v63 = vld [vmem:[%s1432_s9 + $0x80] sm:$0xff] }
  0x6f   : > { %632 = vmatpush.msrb.mxu0 %v473_v11  ;;  %670 = vmatpush.msrb.mxu2 %v288_v21  ;;  %v318_v0 = vld [vmem:[%s1432_s9 + $0x218] sm:$0xff]  ;;  %v384_v1 = vld [vmem:[%s1432_s9 + $0x428] sm:$0xff]  ;;  %v315_v4 = vld [vmem:[%s1432_s9 + $0x200] sm:$0xff] }
  0x70   : > { %652 = vmatpush.msrb.mxu1 %v521_v12  ;;  %603 = vmatmul.f32.vlgmr.msra.gmra.mxu2 %v1527_v25  ;;  %v432_v2 = vld [vmem:[%s1432_s9 + $0x5a8] sm:$0xff]  ;;  %v381_v5 = vld [vmem:[%s1432_s9 + $0x410] sm:$0xff]  ;;  %v378_v9 = vld [vmem:[%s1432_s9 + $0x3f8] sm:$0xff] }
  0x71   : > { %633 = vmatpush.msrb.mxu0 %v470_v15  ;;  %690 = vmatpush.msrb.mxu3 %v336_v26  ;;  %v264_v3 = vld [vmem:[%s1432_s9 + $0x68] sm:$0xff]  ;;  %v429_v6 = vld [vmem:[%s1432_s9 + $0x590] sm:$0xff]  ;;  %v426_v10 = vld [vmem:[%s1432_s9 + $0x578] sm:$0xff] }
  0x72   : > { %653 = vmatpush.msrb.mxu1 %v518_v16  ;;  %671 = vmatpush.msrb.mxu2 %v285_v29  ;;  %v261_v7 = vld [vmem:[%s1432_s9 + $0x50] sm:$0xff]  ;;  %v312_v8 = vld [vmem:[%s1432_s9 + $0x1e8] sm:$0xff]  ;;  %v258_v11 = vld [vmem:[%s1432_s9 + $0x38] sm:$0xff] }
  0x73   : > { %634 = vmatpush.msrb.mxu0 %v467_v19  ;;  %623 = vmatmul.f32.vlgmr.msra.gmra.mxu3 %v1538_v33  ;;  %v309_v12 = vld [vmem:[%s1432_s9 + $0x1d0] sm:$0xff]  ;;  %v375_v13 = vld [vmem:[%s1432_s9 + $0x3e0] sm:$0xff]  ;;  %v306_v16 = vld [vmem:[%s1432_s9 + $0x1b8] sm:$0xff] }
  0x74   : > { %654 = vmatpush.msrb.mxu1 %v515_v20  ;;  %563 = vmatmul.f32.vlgmr.msra.gmra.mxu0 %v1533_v30  ;;  %v423_v14 = vld [vmem:[%s1432_s9 + $0x560] sm:$0xff]  ;;  %v372_v17 = vld [vmem:[%s1432_s9 + $0x3c8] sm:$0xff]  ;;  %v369_v21 = vld [vmem:[%s1432_s9 + $0x3b0] sm:$0xff] }
  0x75   : > { %635 = vmatpush.msrb.mxu0 %v464_v23  ;;  %672 = vmatpush.msrb.mxu2 %v282_v34  ;;  %v255_v15 = vld [vmem:[%s1432_s9 + $0x20] sm:$0xff]  ;;  %v420_v18 = vld [vmem:[%s1432_s9 + $0x548] sm:$0xff]  ;;  %v417_v22 = vld [vmem:[%s1432_s9 + $0x530] sm:$0xff] }
  0x76   : > { %655 = vmatpush.msrb.mxu1 %v512_v24  ;;  %691 = vmatpush.msrb.mxu3 %v333_v37  ;;  %v252_v19 = vld [vmem:[%s1432_s9 + $0x8] sm:$0xff]  ;;  %v303_v20 = vld [vmem:[%s1432_s9 + $0x1a0] sm:$0xff]  ;;  %v489_v23 = vld [vmem:[%s1432_s9 + $0x770] sm:$0xff] }
  0x77   : > { %636 = vmatpush.msrb.mxu0 %v461_v27  ;;  %583 = vmatmul.f32.vlgmr.msra.gmra.mxu1 %v1545_v38  ;;  %v300_v24 = vld [vmem:[%s1432_s9 + $0x188] sm:$0xff]  ;;  %v366_v26 = vld [vmem:[%s1432_s9 + $0x398] sm:$0xff]  ;;  %v537_v29 = vld [vmem:[%s1432_s9 + $0x8f0] sm:$0xff] }
  0x78   : > { %656 = vmatpush.msrb.mxu1 %v509_v28  ;;  %673 = vmatpush.msrb.mxu2 %v279_v41  ;;  %v414_v27 = vld [vmem:[%s1432_s9 + $0x518] sm:$0xff]  ;;  %v483_v34 = vld [vmem:[%s1432_s9 + $0x740] sm:$0xff]  ;;  %v408_v37 = vld [vmem:[%s1432_s9 + $0x4e8] sm:$0xff] }
  0x79   : > { %637 = vmatpush.msrb.mxu0 %v458_v31  ;;  %692 = vmatpush.msrb.mxu3 %v330_v42  ;;  %v486_v28 = vld [vmem:[%s1432_s9 + $0x758] sm:$0xff]  ;;  %v363_v31 = vld [vmem:[%s1432_s9 + $0x380] sm:$0xff]  ;;  %v357_v41 = vld [vmem:[%s1432_s9 + $0x350] sm:$0xff] }
  0x7a   : > { %657 = vmatpush.msrb.mxu1 %v506_v32  ;;  %674 = vmatpush.msrb.mxu2 %v276_v45  ;;  %v411_v32 = vld [vmem:[%s1432_s9 + $0x500] sm:$0xff]  ;;  %v405_v42 = vld [vmem:[%s1432_s9 + $0x4d0] sm:$0xff]  ;;  %v354_v45 = vld [vmem:[%s1432_s9 + $0x338] sm:$0xff] }
  0x7b   : > { %638 = vmatpush.msrb.mxu0 %v455_v35  ;;  %693 = vmatpush.msrb.mxu3 %v327_v46  ;;  %v534_v35 = vld [vmem:[%s1432_s9 + $0x8d8] sm:$0xff] }
  0x7c   : > { %658 = vmatpush.msrb.mxu1 %v503_v36  ;;  %675 = vmatpush.msrb.mxu2 %v273_v49  ;;  %v360_v36 = vld [vmem:[%s1432_s9 + $0x368] sm:$0xff]  ;;  %v402_v46 = vld [vmem:[%s1432_s9 + $0x4b8] sm:$0xff]  ;;  %v351_v49 = vld [vmem:[%s1432_s9 + $0x320] sm:$0xff] }
  0x7d   : > { %639 = vmatpush.msrb.mxu0 %v452_v39  ;;  %694 = vmatpush.msrb.mxu3 %v324_v50  ;;  %v480_v39 = vld [vmem:[%s1432_s9 + $0x728] sm:$0xff]  ;;  %v399_v50 = vld [vmem:[%s1432_s9 + $0x4a0] sm:$0xff] }
  0x7e   : > { %659 = vmatpush.msrb.mxu1 %v500_v40  ;;  %676 = vmatpush.msrb.mxu2 %v270_v56  ;;  %v531_v40 = vld [vmem:[%s1432_s9 + $0x8c0] sm:$0xff]  ;;  %v298_v56 = vld [vmem:[%s1432_s9 + $0x178] sm:$0xff] }
  0x7f   : > { %640 = vmatpush.msrb.mxu0 %v449_v43  ;;  %695 = vmatpush.msrb.mxu3 %v321_v59  ;;  %v477_v43 = vld [vmem:[%s1432_s9 + $0x710] sm:$0xff]  ;;  %v519_v59 = vld [vmem:[%s1432_s9 + $0x860] sm:$0xff] }
  0x80   : > { %660 = vmatpush.msrb.mxu1 %v497_v44  ;;  %677 = vmatpush.msrb.mxu2 %v267_v63  ;;  %v528_v44 = vld [vmem:[%s1432_s9 + $0x8a8] sm:$0xff]  ;;  %v465_v63 = vld [vmem:[%s1432_s9 + $0x6b0] sm:$0xff] }
  0x81   : > { %641 = vmatpush.msrb.mxu0 %v446_v47  ;;  %696 = vmatpush.msrb.mxu3 %v318_v0  ;;  %v474_v47 = vld [vmem:[%s1432_s9 + $0x6f8] sm:$0xff]  ;;  %v516_v0 = vld [vmem:[%s1432_s9 + $0x848] sm:$0xff] }
  0x82   : > { %661 = vmatpush.msrb.mxu1 %v494_v48  ;;  %678 = vmatpush.msrb.mxu2 %v264_v3  ;;  %v525_v48 = vld [vmem:[%s1432_s9 + $0x890] sm:$0xff]  ;;  %v462_v3 = vld [vmem:[%s1432_s9 + $0x698] sm:$0xff] }
  0x83   : > { %642 = vmatpush.msrb.mxu0 %v443_v51  ;;  %697 = vmatpush.msrb.mxu3 %v315_v4  ;;  %v471_v51 = vld [vmem:[%s1432_s9 + $0x6e0] sm:$0xff]  ;;  %v513_v4 = vld [vmem:[%s1432_s9 + $0x830] sm:$0xff] }
  0x84   : > { %662 = vmatpush.msrb.mxu1 %v491_v52  ;;  %643 = vmatmul.f32.vlgmr.msrb.gmra.mxu0 %v1565_v55  ;;  %v522_v52 = vld [vmem:[%s1432_s9 + $0x878] sm:$0xff] }
  0x85   : > { %707 = vmatpush.msra.mxu0 %v393_v53  ;;  %663 = vmatmul.f32.vlgmr.msrb.gmra.mxu1 %v1571_v60  ;;  %v348_v53 = vld [vmem:[%s1432_s9 + $0x308] sm:$0xff] }
  0x86   : > { %727 = vmatpush.msra.mxu1 %v441_v54  ;;  %679 = vmatpush.msrb.mxu2 %v261_v7  ;;  %v396_v54 = vld [vmem:[%s1432_s9 + $0x488] sm:$0xff]  ;;  %v459_v7 = vld [vmem:[%s1432_s9 + $0x680] sm:$0xff] }
  0x87   : > { %708 = vmatpush.msra.mxu0 %v390_v57  ;;  %698 = vmatpush.msrb.mxu3 %v312_v8  ;;  %v346_v57 = vld [vmem:[%s1432_s9 + $0x2f8] sm:$0xff] }
  0x88   : > { %728 = vmatpush.msra.mxu1 %v438_v58  ;;  %680 = vmatpush.msrb.mxu2 %v258_v11  ;;  %v468_v58 = vld [vmem:[%s1432_s9 + $0x6c8] sm:$0xff]  ;;  %v510_v8 = vld [vmem:[%s1432_s9 + $0x818] sm:$0xff] }
  0x89   : > { %709 = vmatpush.msra.mxu0 %v387_v61  ;;  %699 = vmatpush.msrb.mxu3 %v309_v12  ;;  %v295_v61 = vld [vmem:[%s1432_s9 + $0x160] sm:$0xff]  ;;  %v456_v11 = vld [vmem:[%s1432_s9 + $0x668] sm:$0xff] }
  0x8a   : > { %729 = vmatpush.msra.mxu1 %v435_v62  ;;  %681 = vmatpush.msrb.mxu2 %v255_v15  ;;  %v343_v62 = vld [vmem:[%s1432_s9 + $0x2e0] sm:$0xff]  ;;  %v453_v15 = vld [vmem:[%s1432_s9 + $0x650] sm:$0xff] }
  0x8b   : > { %710 = vmatpush.msra.mxu0 %v384_v1  ;;  %700 = vmatpush.msrb.mxu3 %v306_v16  ;;  %v292_v1 = vld [vmem:[%s1432_s9 + $0x148] sm:$0xff]  ;;  %v507_v12 = vld [vmem:[%s1432_s9 + $0x800] sm:$0xff] }
  0x8c   : > { %730 = vmatpush.msra.mxu1 %v432_v2  ;;  %682 = vmatpush.msrb.mxu2 %v252_v19  ;;  %v340_v2 = vld [vmem:[%s1432_s9 + $0x2c8] sm:$0xff]  ;;  %v450_v19 = vld [vmem:[%s1432_s9 + $0x638] sm:$0xff] }
  0x8d   : > { %711 = vmatpush.msra.mxu0 %v381_v5  ;;  %701 = vmatpush.msrb.mxu3 %v303_v20  ;;  %v289_v5 = vld [vmem:[%s1432_s9 + $0x130] sm:$0xff]  ;;  %v504_v16 = vld [vmem:[%s1432_s9 + $0x7e8] sm:$0xff] }
  0x8e   : > { %731 = vmatpush.msra.mxu1 %v429_v6  ;;  %747 = vmatpush.msra.mxu2 %v489_v23  ;;  %v337_v6 = vld [vmem:[%s1432_s9 + $0x2b0] sm:$0xff]  ;;  %v447_v23 = vld [vmem:[%s1432_s9 + $0x620] sm:$0xff] }
  0x8f   : > { %712 = vmatpush.msra.mxu0 %v378_v9  ;;  %702 = vmatpush.msrb.mxu3 %v300_v24  ;;  %v286_v9 = vld [vmem:[%s1432_s9 + $0x118] sm:$0xff]  ;;  %v501_v20 = vld [vmem:[%s1432_s9 + $0x7d0] sm:$0xff] }
  0x90   : > { %732 = vmatpush.msra.mxu1 %v426_v10  ;;  %748 = vmatpush.msra.mxu2 %v486_v28  ;;  %v334_v10 = vld [vmem:[%s1432_s9 + $0x298] sm:$0xff]  ;;  %v444_v28 = vld [vmem:[%s1432_s9 + $0x608] sm:$0xff] }
  0x91   : > { %713 = vmatpush.msra.mxu0 %v375_v13  ;;  %767 = vmatpush.msra.mxu3 %v537_v29  ;;  %v283_v13 = vld [vmem:[%s1432_s9 + $0x100] sm:$0xff]  ;;  %v498_v24 = vld [vmem:[%s1432_s9 + $0x7b8] sm:$0xff] }
  0x92   : > { %733 = vmatpush.msra.mxu1 %v423_v14  ;;  %749 = vmatpush.msra.mxu2 %v483_v34  ;;  %v331_v14 = vld [vmem:[%s1432_s9 + $0x280] sm:$0xff]  ;;  %v492_v34 = vld [vmem:[%s1432_s9 + $0x788] sm:$0xff] }
  0x93   : > { %714 = vmatpush.msra.mxu0 %v372_v17  ;;  %768 = vmatpush.msra.mxu3 %v534_v35  ;;  %v280_v17 = vld [vmem:[%s1432_s9 + $0xe8] sm:$0xff]  ;;  %v495_v29 = vld [vmem:[%s1432_s9 + $0x7a0] sm:$0xff] }
  0x94   : > { %734 = vmatpush.msra.mxu1 %v420_v18  ;;  %750 = vmatpush.msra.mxu2 %v480_v39  ;;  %v328_v18 = vld [vmem:[%s1432_s9 + $0x268] sm:$0xff]  ;;  %v265_v39 = vld [vmem:[%s1432_s9 + $0x70] sm:$0xff] }
  0x95   : > { %715 = vmatpush.msra.mxu0 %v369_v21  ;;  %769 = vmatpush.msra.mxu3 %v531_v40  ;;  %v277_v21 = vld [vmem:[%s1432_s9 + $0xd0] sm:$0xff]  ;;  %v268_v35 = vld [vmem:[%s1432_s9 + $0x88] sm:$0xff]  ;;  %v391_v40 = vld [vmem:[%s1432_s9 + $0x460] sm:$0xff] }
  0x96   : > { %735 = vmatpush.msra.mxu1 %v417_v22  ;;  %751 = vmatpush.msra.mxu2 %v477_v43  ;;  %v325_v22 = vld [vmem:[%s1432_s9 + $0x250] sm:$0xff]  ;;  %v262_v43 = vld [vmem:[%s1432_s9 + $0x58] sm:$0xff] }
  0x97   : > { %716 = vmatpush.msra.mxu0 %v366_v26  ;;  %770 = vmatpush.msra.mxu3 %v528_v44  ;;  %v274_v26 = vld [vmem:[%s1432_s9 + $0xb8] sm:$0xff]  ;;  %v388_v44 = vld [vmem:[%s1432_s9 + $0x448] sm:$0xff] }
  0x98   : > { %736 = vmatpush.msra.mxu1 %v414_v27  ;;  %752 = vmatpush.msra.mxu2 %v474_v47  ;;  %v322_v27 = vld [vmem:[%s1432_s9 + $0x238] sm:$0xff]  ;;  %v259_v47 = vld [vmem:[%s1432_s9 + $0x40] sm:$0xff] }
  0x99   : > { %717 = vmatpush.msra.mxu0 %v363_v31  ;;  %771 = vmatpush.msra.mxu3 %v525_v48  ;;  %v271_v31 = vld [vmem:[%s1432_s9 + $0xa0] sm:$0xff]  ;;  %v385_v48 = vld [vmem:[%s1432_s9 + $0x430] sm:$0xff] }
  0x9a   : > { %737 = vmatpush.msra.mxu1 %v411_v32  ;;  %753 = vmatpush.msra.mxu2 %v471_v51  ;;  %v319_v32 = vld [vmem:[%s1432_s9 + $0x220] sm:$0xff]  ;;  %v256_v51 = vld [vmem:[%s1432_s9 + $0x28] sm:$0xff] }
  0x9b   : > { %718 = vmatpush.msra.mxu0 %v360_v36  ;;  %772 = vmatpush.msra.mxu3 %v522_v52  ;;  %v394_v36 = vld [vmem:[%s1432_s9 + $0x478] sm:$0xff] }
  0x9c   : > { %738 = vmatpush.msra.mxu1 %v408_v37  ;;  %754 = vmatpush.msra.mxu2 %v468_v58  ;;  %v316_v37 = vld [vmem:[%s1432_s9 + $0x208] sm:$0xff]  ;;  %v382_v52 = vld [vmem:[%s1432_s9 + $0x418] sm:$0xff] }
  0x9d   : > { %719 = vmatpush.msra.mxu0 %v357_v41  ;;  %773 = vmatpush.msra.mxu3 %v519_v59  ;;  %v442_v41 = vld [vmem:[%s1432_s9 + $0x5f8] sm:$0xff] }
  0x9e   : > { %739 = vmatpush.msra.mxu1 %v405_v42  ;;  %755 = vmatpush.msra.mxu2 %v465_v63  ;;  %v313_v42 = vld [vmem:[%s1432_s9 + $0x1f0] sm:$0xff]  ;;  %v430_v58 = vld [vmem:[%s1432_s9 + $0x598] sm:$0xff]  ;;  %v427_v63 = vld [vmem:[%s1432_s9 + $0x580] sm:$0xff] }
  0x9f   : > { %720 = vmatpush.msra.mxu0 %v354_v45  ;;  %774 = vmatpush.msra.mxu3 %v516_v0  ;;  %v439_v45 = vld [vmem:[%s1432_s9 + $0x5e0] sm:$0xff]  ;;  %v490_v59 = vld [vmem:[%s1432_s9 + $0x778] sm:$0xff] }
  0xa0   : > { %740 = vmatpush.msra.mxu1 %v402_v46  ;;  %756 = vmatpush.msra.mxu2 %v462_v3  ;;  %v310_v46 = vld [vmem:[%s1432_s9 + $0x1d8] sm:$0xff]  ;;  %v487_v0 = vld [vmem:[%s1432_s9 + $0x760] sm:$0xff]  ;;  %v424_v3 = vld [vmem:[%s1432_s9 + $0x568] sm:$0xff] }
  0xa1   : > { %721 = vmatpush.msra.mxu0 %v351_v49  ;;  %775 = vmatpush.msra.mxu3 %v513_v4  ;;  %v436_v49 = vld [vmem:[%s1432_s9 + $0x5c8] sm:$0xff] }
  0xa2   : > { %741 = vmatpush.msra.mxu1 %v399_v50  ;;  %757 = vmatpush.msra.mxu2 %v459_v7  ;;  %v307_v50 = vld [vmem:[%s1432_s9 + $0x1c0] sm:$0xff]  ;;  %v484_v4 = vld [vmem:[%s1432_s9 + $0x748] sm:$0xff]  ;;  %v421_v7 = vld [vmem:[%s1432_s9 + $0x550] sm:$0xff] }
  0xa3   : > { %722 = vmatpush.msra.mxu0 %v348_v53  ;;  %776 = vmatpush.msra.mxu3 %v510_v8  ;;  %v433_v53 = vld [vmem:[%s1432_s9 + $0x5b0] sm:$0xff] }
  0xa4   : > { %742 = vmatpush.msra.mxu1 %v396_v54  ;;  %758 = vmatpush.msra.mxu2 %v456_v11  ;;  %v253_v54 = vld [vmem:[%s1432_s9 + $0x10] sm:$0xff]  ;;  %v418_v11 = vld [vmem:[%s1432_s9 + $0x538] sm:$0xff] }
  0xa5   : > { %787 = vmatpush.msrb.mxu0 %v298_v56  ;;  %777 = vmatpush.msra.mxu3 %v507_v12  ;;  %v304_v56 = vld [vmem:[%s1432_s9 + $0x1a8] sm:$0xff]  ;;  %v481_v8 = vld [vmem:[%s1432_s9 + $0x730] sm:$0xff]  ;;  %v478_v12 = vld [vmem:[%s1432_s9 + $0x718] sm:$0xff] }
  0xa6   : > { %807 = vmatpush.msrb.mxu1 %v346_v57  ;;  %759 = vmatpush.msra.mxu2 %v453_v15  ;;  %v379_v57 = vld [vmem:[%s1432_s9 + $0x400] sm:$0xff] }
  0xa7   : > { %788 = vmatpush.msrb.mxu0 %v295_v61  ;;  %778 = vmatpush.msra.mxu3 %v504_v16  ;;  %v301_v61 = vld [vmem:[%s1432_s9 + $0x190] sm:$0xff]  ;;  %v415_v15 = vld [vmem:[%s1432_s9 + $0x520] sm:$0xff] }
  0xa8   : > { %808 = vmatpush.msrb.mxu1 %v343_v62  ;;  %760 = vmatpush.msra.mxu2 %v450_v19  ;;  %v376_v62 = vld [vmem:[%s1432_s9 + $0x3e8] sm:$0xff]  ;;  %v475_v16 = vld [vmem:[%s1432_s9 + $0x700] sm:$0xff] }
  0xa9   : > { %789 = vmatpush.msrb.mxu0 %v292_v1  ;;  %779 = vmatpush.msra.mxu3 %v501_v20  ;;  %v538_v1 = vld [vmem:[%s1432_s9 + $0x8f8] sm:$0xff]  ;;  %v412_v19 = vld [vmem:[%s1432_s9 + $0x508] sm:$0xff] }
  0xaa   : > { %809 = vmatpush.msrb.mxu1 %v340_v2  ;;  %761 = vmatpush.msra.mxu2 %v447_v23  ;;  %v373_v2 = vld [vmem:[%s1432_s9 + $0x3d0] sm:$0xff]  ;;  %v472_v20 = vld [vmem:[%s1432_s9 + $0x6e8] sm:$0xff] }
  0xab   : > { %790 = vmatpush.msrb.mxu0 %v289_v5  ;;  %780 = vmatpush.msra.mxu3 %v498_v24  ;;  %v535_v5 = vld [vmem:[%s1432_s9 + $0x8e0] sm:$0xff]  ;;  %v409_v23 = vld [vmem:[%s1432_s9 + $0x4f0] sm:$0xff] }
  0xac   : > { %810 = vmatpush.msrb.mxu1 %v337_v6  ;;  %762 = vmatpush.msra.mxu2 %v444_v28  ;;  %v370_v6 = vld [vmem:[%s1432_s9 + $0x3b8] sm:$0xff]  ;;  %v469_v24 = vld [vmem:[%s1432_s9 + $0x6d0] sm:$0xff] }
  0xad   : > { %791 = vmatpush.msrb.mxu0 %v286_v9  ;;  %781 = vmatpush.msra.mxu3 %v495_v29  ;;  %v532_v9 = vld [vmem:[%s1432_s9 + $0x8c8] sm:$0xff]  ;;  %v406_v28 = vld [vmem:[%s1432_s9 + $0x4d8] sm:$0xff] }
  0xae   : > { %811 = vmatpush.msrb.mxu1 %v334_v10  ;;  %683 = vmatmul.f32.vlgmr.msrb.gmra.mxu2 %v1533_v30  ;;  %v367_v10 = vld [vmem:[%s1432_s9 + $0x3a0] sm:$0xff]  ;;  %v466_v29 = vld [vmem:[%s1432_s9 + $0x6b8] sm:$0xff] }
  0xaf   : > { %792 = vmatpush.msrb.mxu0 %v283_v13  ;;  %782 = vmatpush.msra.mxu3 %v492_v34  ;;  %v529_v13 = vld [vmem:[%s1432_s9 + $0x8b0] sm:$0xff]  ;;  %v403_v34 = vld [vmem:[%s1432_s9 + $0x4c0] sm:$0xff] }
  0xb0   : > { %812 = vmatpush.msrb.mxu1 %v331_v14  ;;  %827 = vmatpush.msrb.mxu2 %v394_v36  ;;  %v364_v14 = vld [vmem:[%s1432_s9 + $0x388] sm:$0xff]  ;;  %v514_v36 = vld [vmem:[%s1432_s9 + $0x838] sm:$0xff] }
  0xb1   : > { %793 = vmatpush.msrb.mxu0 %v280_v17  ;;  %703 = vmatmul.f32.vlgmr.msrb.gmra.mxu3 %v1545_v38  ;;  %v526_v17 = vld [vmem:[%s1432_s9 + $0x898] sm:$0xff] }
  0xb2   : > { %813 = vmatpush.msrb.mxu1 %v328_v18  ;;  %828 = vmatpush.msrb.mxu2 %v391_v40  ;;  %v361_v18 = vld [vmem:[%s1432_s9 + $0x370] sm:$0xff]  ;;  %v460_v40 = vld [vmem:[%s1432_s9 + $0x688] sm:$0xff] }
  0xb3   : > { %794 = vmatpush.msrb.mxu0 %v277_v21  ;;  %847 = vmatpush.msrb.mxu3 %v442_v41  ;;  %v523_v21 = vld [vmem:[%s1432_s9 + $0x880] sm:$0xff] }
  0xb4   : > { %814 = vmatpush.msrb.mxu1 %v325_v22  ;;  %829 = vmatpush.msrb.mxu2 %v388_v44  ;;  %v358_v22 = vld [vmem:[%s1432_s9 + $0x358] sm:$0xff]  ;;  %v511_v41 = vld [vmem:[%s1432_s9 + $0x820] sm:$0xff]  ;;  %v508_v44 = vld [vmem:[%s1432_s9 + $0x808] sm:$0xff] }
  0xb5   : > { %795 = vmatpush.msrb.mxu0 %v274_v26  ;;  %848 = vmatpush.msrb.mxu3 %v439_v45  ;;  %v520_v26 = vld [vmem:[%s1432_s9 + $0x868] sm:$0xff]  ;;  %v454_v45 = vld [vmem:[%s1432_s9 + $0x658] sm:$0xff] }
  0xb6   : > { %815 = vmatpush.msrb.mxu1 %v322_v27  ;;  %830 = vmatpush.msrb.mxu2 %v385_v48  ;;  %v355_v27 = vld [vmem:[%s1432_s9 + $0x340] sm:$0xff]  ;;  %v502_v48 = vld [vmem:[%s1432_s9 + $0x7d8] sm:$0xff] }
  0xb7   : > { %796 = vmatpush.msrb.mxu0 %v271_v31  ;;  %849 = vmatpush.msrb.mxu3 %v436_v49  ;;  %v517_v31 = vld [vmem:[%s1432_s9 + $0x850] sm:$0xff]  ;;  %v448_v49 = vld [vmem:[%s1432_s9 + $0x628] sm:$0xff] }
  0xb8   : > { %816 = vmatpush.msrb.mxu1 %v319_v32  ;;  %763 = vmatmul.f32.vlgmr.msra.gmra.mxu2 %v1565_v55  ;;  %v352_v32 = vld [vmem:[%s1432_s9 + $0x328] sm:$0xff] }
  0xb9   : > { %797 = vmatpush.msrb.mxu0 %v268_v35  ;;  %831 = vmatpush.msrb.mxu2 %v382_v52  ;;  %v463_v35 = vld [vmem:[%s1432_s9 + $0x6a0] sm:$0xff] }
  0xba   : > { %817 = vmatpush.msrb.mxu1 %v316_v37  ;;  %850 = vmatpush.msrb.mxu3 %v433_v53  ;;  %v349_v37 = vld [vmem:[%s1432_s9 + $0x310] sm:$0xff] }
  0xbb   : > { %798 = vmatpush.msrb.mxu0 %v265_v39  ;;  %783 = vmatmul.f32.vlgmr.msra.gmra.mxu3 %v1571_v60  ;;  %v400_v39 = vld [vmem:[%s1432_s9 + $0x4a8] sm:$0xff] }
  0xbc   : > { %818 = vmatpush.msrb.mxu1 %v313_v42  ;;  %723 = vmatmul.f32.vlgmr.msra.gmra.mxu0 %v1527_v25  ;;  %v397_v42 = vld [vmem:[%s1432_s9 + $0x490] sm:$0xff] }
  0xbd   : > { %799 = vmatpush.msrb.mxu0 %v262_v43  ;;  %832 = vmatpush.msrb.mxu2 %v379_v57  ;;  %v457_v43 = vld [vmem:[%s1432_s9 + $0x670] sm:$0xff] }
  0xbe   : > { %819 = vmatpush.msrb.mxu1 %v310_v46  ;;  %851 = vmatpush.msrb.mxu3 %v430_v58  ;;  %v505_v46 = vld [vmem:[%s1432_s9 + $0x7f0] sm:$0xff] }
  0xbf   : > { %800 = vmatpush.msrb.mxu0 %v259_v47  ;;  %743 = vmatmul.f32.vlgmr.msra.gmra.mxu1 %v1538_v33  ;;  %v451_v47 = vld [vmem:[%s1432_s9 + $0x640] sm:$0xff] }
  0xc0   : > { %820 = vmatpush.msrb.mxu1 %v307_v50  ;;  %833 = vmatpush.msrb.mxu2 %v376_v62  ;;  %v445_v50 = vld [vmem:[%s1432_s9 + $0x610] sm:$0xff] }
  0xc1   : > { %801 = vmatpush.msrb.mxu0 %v256_v51  ;;  %852 = vmatpush.msrb.mxu3 %v427_v63  ;;  %v496_v51 = vld [vmem:[%s1432_s9 + $0x7a8] sm:$0xff] }
  0xc2   : > { %821 = vmatpush.msrb.mxu1 %v304_v56  ;;  %834 = vmatpush.msrb.mxu2 %v373_v2 }
  0xc3   : > { %802 = vmatpush.msrb.mxu0 %v253_v54  ;;  %853 = vmatpush.msrb.mxu3 %v424_v3 }
  0xc4   : > { %822 = vmatpush.msrb.mxu1 %v301_v61  ;;  %835 = vmatpush.msrb.mxu2 %v370_v6 }
  0xc5   : > { %867 = vmatpush.msra.mxu0 %v490_v59  ;;  %854 = vmatpush.msrb.mxu3 %v421_v7 }
  0xc6   : > { %887 = vmatpush.msra.mxu1 %v538_v1  ;;  %836 = vmatpush.msrb.mxu2 %v367_v10 }
  0xc7   : > { %868 = vmatpush.msra.mxu0 %v487_v0  ;;  %855 = vmatpush.msrb.mxu3 %v418_v11 }
  0xc8   : > { %888 = vmatpush.msra.mxu1 %v535_v5  ;;  %837 = vmatpush.msrb.mxu2 %v364_v14 }
  0xc9   : > { %869 = vmatpush.msra.mxu0 %v484_v4  ;;  %856 = vmatpush.msrb.mxu3 %v415_v15 }
  0xca   : > { %889 = vmatpush.msra.mxu1 %v532_v9  ;;  %838 = vmatpush.msrb.mxu2 %v361_v18 }
  0xcb   : > { %870 = vmatpush.msra.mxu0 %v481_v8  ;;  %857 = vmatpush.msrb.mxu3 %v412_v19 }
  0xcc   : > { %890 = vmatpush.msra.mxu1 %v529_v13  ;;  %839 = vmatpush.msrb.mxu2 %v358_v22 }
  0xcd   : > { %871 = vmatpush.msra.mxu0 %v478_v12  ;;  %858 = vmatpush.msrb.mxu3 %v409_v23 }
  0xce   : > { %891 = vmatpush.msra.mxu1 %v526_v17  ;;  %840 = vmatpush.msrb.mxu2 %v355_v27 }
  0xcf   : > { %872 = vmatpush.msra.mxu0 %v475_v16  ;;  %859 = vmatpush.msrb.mxu3 %v406_v28 }
  0xd0   : > { %892 = vmatpush.msra.mxu1 %v523_v21  ;;  %841 = vmatpush.msrb.mxu2 %v352_v32 }
  0xd1   : > { %873 = vmatpush.msra.mxu0 %v472_v20  ;;  %860 = vmatpush.msrb.mxu3 %v403_v34 }
  0xd2   : > { %893 = vmatpush.msra.mxu1 %v520_v26  ;;  %842 = vmatpush.msrb.mxu2 %v349_v37 }
  0xd3   : > { %874 = vmatpush.msra.mxu0 %v469_v24  ;;  %861 = vmatpush.msrb.mxu3 %v400_v39 }
  0xd4   : > { %894 = vmatpush.msra.mxu1 %v517_v31  ;;  %843 = vmatmul.f32.vlgmr.msrb.gmra.mxu2 %v1527_v25  ;;  %v499_v25 = vld [vmem:[%s1432_s9 + $0x7c0] sm:$0xff] }
  0xd5   : > { %875 = vmatpush.msra.mxu0 %v466_v29  ;;  %862 = vmatpush.msrb.mxu3 %v397_v42 }
  0xd6   : > { %895 = vmatpush.msra.mxu1 %v514_v36  ;;  %803 = vmatmul.f32.vlgmr.msrb.gmra.mxu0 %v1533_v30  ;;  %v493_v30 = vld [vmem:[%s1432_s9 + $0x790] sm:$0xff] }
  0xd7   : > { %876 = vmatpush.msra.mxu0 %v463_v35  ;;  %863 = vmatmul.f32.vlgmr.msrb.gmra.mxu3 %v1538_v33  ;;  %v539_v33 = vld [vmem:[%s213_s25] sm:$0x7] }
  0xd8   : > { %896 = vmatpush.msra.mxu1 %v511_v41  ;;  %v543_v15 = vperm.slane %v539_v33, 2 }
  0xd9   : > { %877 = vmatpush.msra.mxu0 %v460_v40  ;;  %823 = vmatmul.f32.vlgmr.msrb.gmra.mxu1 %v1545_v38  ;;  %v541_v38 = vperm.slane %v539_v33, 0 }
  0xda   : > { %897 = vmatpush.msra.mxu1 %v508_v44 }
  0xdb   : > { %878 = vmatpush.msra.mxu0 %v457_v43 }
  0xdc   : > { %898 = vmatpush.msra.mxu1 %v505_v46 }
  0xdd   : > { %879 = vmatpush.msra.mxu0 %v454_v45 }
  0xde   : > { %899 = vmatpush.msra.mxu1 %v502_v48 }
  0xdf   : > { %880 = vmatpush.msra.mxu0 %v451_v47 }
  0xe0   : > { %900 = vmatpush.msra.mxu1 %v499_v25 }
  0xe1   : > { %881 = vmatpush.msra.mxu0 %v448_v49 }
  0xe2   : > { %901 = vmatpush.msra.mxu1 %v496_v51 }
  0xe3   : > { %882 = vmatpush.msra.mxu0 %v445_v50 }
  0xe4   : > { %883 = vmatmul.f32.vlgmr.msra.gmra.mxu0 %v1565_v55  ;;  %902 = vmatpush.msra.mxu1 %v493_v30 }
  0xe5   : > { %903 = vmatmul.f32.vlgmr.msra.gmra.mxu1 %v1571_v60  ;;  %v542_v60 = vperm.slane %v539_v33, 1 }
  0xf1   : > { %v564_v52 = vpop.f32.mrf.mxu0 }
  0xf2   : > { %v565_v53 = vadd.f32 %v564_v52, %v541_v38 }
  0xf3   : > { %v604_v56 = vpop.f32.mrf.mxu2 }
  0xf4   : > { %v584_v54 = vpop.f32.mrf.mxu1 }
  0xf5   : > { %v585_v57 = vadd.f32 %v584_v54, %v565_v53 }
  0xf6   : > { %v624_v59 = vpop.f32.mrf.mxu3 }
  0xf7   : > { %v605_v58 = vadd.f32 %v604_v56, %v585_v57 }
  0xf9   : > { %v625_v61 = vadd.f32 %v624_v59, %v605_v58 }
 0x101   : > { %v644_v62 = vpop.f32.mrf.mxu0 }
 0x102   : > { %v645_v63 = vadd.f32 %v644_v62, %v625_v61  ;;  %v664_v55 = vpop.f32.mrf.mxu1 }
 0x104   : > { %v665_v0 = vadd.f32 %v664_v55, %v645_v63 }
 0x106   : > { %v907_v1 = vmax.f32 %v665_v0, 0.0 }
 0x108   : > { %910 = vst [vmem:[%s1758_s11] sm:$0xff] %v907_v1 }
 0x131   : > { %v684_v2 = vpop.f32.mrf.mxu2 }
 0x132   : > { %v685_v3 = vadd.f32 %v684_v2, %v542_v60 }
 0x134   : > { %v704_v4 = vpop.f32.mrf.mxu3 }
 0x135   : > { %v705_v5 = vadd.f32 %v704_v4, %v685_v3 }
 0x139   : > { %v724_v6 = vpop.f32.mrf.mxu0 }
 0x13a   : > { %v725_v7 = vadd.f32 %v724_v6, %v705_v5 }
 0x13b   : > { %v764_v9 = vpop.f32.mrf.mxu2 }
 0x13c   : > { %v744_v8 = vpop.f32.mrf.mxu1 }
 0x13d   : > { %v745_v10 = vadd.f32 %v744_v8, %v725_v7 }
 0x13e   : > { %v784_v12 = vpop.f32.mrf.mxu3 }
 0x13f   : > { %v765_v11 = vadd.f32 %v764_v9, %v745_v10 }
 0x141   : > { %v785_v13 = vadd.f32 %v784_v12, %v765_v11 }
 0x143   : > { %v908_v14 = vmax.f32 %v785_v13, 0.0 }
 0x145   : > { %911 = vst [vmem:[%s1758_s11 + $0x8] sm:$0xff] %v908_v14 }
 0x153   : > { %v804_v16 = vpop.f32.mrf.mxu0 }
 0x154   : > { %v805_v17 = vadd.f32 %v804_v16, %v543_v15 }
 0x156   : > { %v824_v18 = vpop.f32.mrf.mxu1 }
 0x157   : > { %v825_v19 = vadd.f32 %v824_v18, %v805_v17  ;;  %v844_v20 = vpop.f32.mrf.mxu2 }
 0x159   : > { %v845_v21 = vadd.f32 %v844_v20, %v825_v19 }
 0x15a   : > { %v864_v22 = vpop.f32.mrf.mxu3 }
 0x15b   : > { %v865_v23 = vadd.f32 %v864_v22, %v845_v21 }
 0x161   : > { %v884_v24 = vpop.f32.mrf.mxu0 }
 0x162   : > { %v885_v26 = vadd.f32 %v884_v24, %v865_v23  ;;  %v904_v27 = vpop.f32.mrf.mxu1 }
 0x164   : > { %v905_v28 = vadd.f32 %v904_v27, %v885_v26 }
 0x166   : > { %v909_v29 = vmax.f32 %v905_v28, 0.0 }
 0x168   : > { %912 = vst [vmem:[%s1758_s11 + $0x10] sm:$0xff] %v909_v29 }
 0x169   : > { %1231 = shalt.err (!%p1228_p5)
}
 0x16a   : > { %1057 = dma.vmem_to_hbm [thread:$0]  (%p1383_p11), %s928_s21, 384, %s930_s28, %s914_s29  }
 0x16b PF: > { %s941_s30 = sand.u32 1, %s1262_s12   ;;  %p1808_p7 = scmp.ge.s32.totalorder %s1274_s15, 2 }
 0x16c   : > { %s942_s9 = scalar_lea.sflag [#allocation4], %s941_s30 }
 0x16d   : > { %p1071_p9 = pnand %p1808_p7, %p1387_p12 }
 0x16f   : > { %p1072_p13 = pneg %p1071_p9 }
 0x171   : > { %1257 = dma.done.wait (%p1072_p13), %s942_s9, 384  }
 0x172   : > { %1259 = vsyncadd (%p1072_p13), %s942_s9, 4294966912  ;;  %p17_p0 = scmp.ge.s32.totalorder %s1321_s16, 4   ;;  %s1809_s12 = smov %s1266_s13 }
 0x173   : > { %s1810_s13 = smov %s1270_s14  ;;  %s1811_s14 = smov %s1332_s19 }
 0x174   : > { %s1812_s15 = smov %s1321_s16  ;;  %19 = sbr.rel (!%p17_p0) target bundleno = 8 (0x8), region = 93 }
 0x179   :  { %948 = vsyncpa [#allocation3], 1 }
 0x17a   :  { %950 = vsyncpa [#allocation3 + $0x1], 1 }
 0x17b   :  { %951 = vsyncpa [#allocation6], 1 }
 0x17c   :  { %953 = vsyncpa [#allocation6 + $0x1], 1 }
 0x17d   :  { %954 = vsyncpa [#allocation4], 1 }
 0x17e   :  { %956 = vsyncpa [#allocation4 + $0x1], 1 }

</bundles_post_ra>
